<compile_context>
chip_gen: v7x
topology: tpu7x:2x2x1
jax: 0.10.0
libtpu: 0.0.40
codegen_flags: <defaults>
</compile_context>

<pallas_src>
import jax
import jax.numpy as jnp
from jax.experimental import pallas as pl
from jax.experimental.pallas import tpu as pltpu


def _hardswish_kernel(x_ref, o_ref):
    x = x_ref[...]
    # x * relu6(x + 3) / 6 — plain VPU elementwise; compute is free filler
    # under the DMA stream, so keep it bit-identical to the reference.
    o_ref[...] = (x * jnp.clip(x + 3.0, 0.0, 6.0) / 6.0).astype(o_ref.dtype)


def _vmem_config():
    """Returns (target_block_bytes, vmem_limit_bytes) for this TPU generation."""
    try:
        vmem = pltpu.get_tpu_info().vmem_capacity_bytes
    except Exception:
        vmem = None
    if vmem is not None and vmem <= (64 << 20):
        # v7x: 64 MiB physical VMEM / 3.2 TB/s HBM.  8 MiB blocks ->
        # 2(in)+2(out) x 8 MiB = 32 MiB live, under a 40 MiB scoped limit.
        return 8 << 20, 40 << 20
    # v5e / v6e (128 MiB physical VMEM): 4 MiB blocks, 16 MiB live, 32 MiB limit
    # (needed on v5e whose default scoped VMEM is only 16 MiB).
    return 4 << 20, 32 << 20


def hardswish(x: jax.Array, *, inplace: bool = False,
              target_block_bytes: int | None = None) -> jax.Array:
    """HardSwish matching torch: x * relu6(x + 3) / 6.  Any shape / dtype."""
    orig_shape = x.shape
    orig_dtype = x.dtype
    n = x.size
    if n == 0:                      # guard: empty tensors pass straight through
        return x

    itemsize = jnp.dtype(orig_dtype).itemsize
    # Minimum sublane multiple per dtype packing (f32: 8, bf16: 16, int8/fp8: 32).
    sub = {4: 8, 2: 16, 1: 32}.get(itemsize, 8)

    # Lane width: largest of {1024, 512, 256, 128} dividing n -> no padded copy
    # and no output slice on the common path.
    W = None
    for cand in (1024, 512, 256, 128):
        if n % cand == 0:
            W = cand
            break
    padded = W is None
    if padded:
        # Rare fallback (n not a multiple of 128): pad by < 128 elements.
        # TODO(synk): an in-kernel masked tail would avoid this extra copy.
        W = 128

    tbb_default, vmem_limit = _vmem_config()
    tbb = target_block_bytes if target_block_bytes is not None else tbb_default

    rows = pl.cdiv(n, W)
    flat = jnp.reshape(x, (-1,))
    if padded:
        flat = jnp.pad(flat, (0, rows * W - n))   # zeros: hardswish(0) == 0
    x2d = jnp.reshape(flat, (rows, W))

    # Row tile sized for ~tbb bytes per buffer, kept a multiple of `sub`.
    tr = max(sub, (tbb // (W * itemsize)) // sub * sub)
    if tr >= rows:
        tr = rows                     # block == full dim (legal for any row count)
        grid = (1,)
    else:
        # Trailing partial block is clipped by Pallas: only valid rows are DMA'd,
        # no zero-streaming through HBM on the tail.
        grid = (pl.cdiv(rows, tr),)

    out2d = pl.pallas_call(
        _hardswish_kernel,
        out_shape=jax.ShapeDtypeStruct((rows, W), orig_dtype),
        grid_spec=pltpu.PrefetchScalarGridSpec(
            num_scalar_prefetch=0,
            grid=grid,
            in_specs=[pl.BlockSpec((tr, W), lambda i: (i, 0))],
            out_specs=pl.BlockSpec((tr, W), lambda i: (i, 0)),
        ),
        compiler_params=pltpu.CompilerParams(
            # Lets the streaming axis shard across TensorCores on multi-TC
            # parts (v7x); near-zero effect (but harmless) on v5e/v6e.
            dimension_semantics=("parallel",),
            vmem_limit_bytes=vmem_limit,
        ),
        # Torch's inplace=True path: alias the (donated) input buffer.
        # Only legal on the no-pad path where input/output shapes match.
        input_output_aliases=({0: 0} if (inplace and not padded) else {}),
    )(x2d)

    out_flat = jnp.reshape(out2d, (-1,))
    if padded:
        out_flat = out_flat[:n]
    return jnp.reshape(out_flat, orig_shape)


def _hardswish_ref(x):
    return x * jnp.clip(x + 3.0, 0.0, 6.0) / 6.0


if __name__ == "__main__":
    key = jax.random.PRNGKey(0)

    # 1) NCHW-style activation (no-pad, single-block path).
    x = jax.random.normal(key, (2, 4, 16, 16), dtype=jnp.float32) * 4.0
    out = jax.block_until_ready(hardswish(x))
    ref = _hardswish_ref(x)
    assert out.shape == x.shape and out.dtype == x.dtype
    assert jnp.allclose(out, ref, atol=1e-6, rtol=1e-6), "mismatch vs reference (main)"

    # 2) Odd-sized tensor exercising the (rare) padded-tail fallback.
    k2 = jax.random.fold_in(key, 1)
    x2 = jax.random.normal(k2, (3, 5, 7), dtype=jnp.float32) * 4.0
    out2 = jax.block_until_ready(hardswish(x2))
    assert jnp.allclose(out2, _hardswish_ref(x2), atol=1e-6, rtol=1e-6), \
        "mismatch vs reference (padded tail)"

    # 3) Multi-block grid with a clipped trailing block (tiny explicit tile).
    k3 = jax.random.fold_in(key, 2)
    x3 = jax.random.normal(k3, (20, 1024), dtype=jnp.float32) * 4.0
    out3 = jax.block_until_ready(hardswish(x3, target_block_bytes=8 * 1024 * 4))
    assert jnp.allclose(out3, _hardswish_ref(x3), atol=1e-6, rtol=1e-6), \
        "mismatch vs reference (clipped tail block)"

    print("KERNEL_OK")
</pallas_src>

<mosaic_0001>
module attributes {stable_mosaic.version = 11 : i64} {
  func.func @_hardswish_kernel(%arg0: i32, %arg1: memref<2x1024xf32, #tpu.memory_space<vmem>>, %arg2: memref<2x1024xf32, #tpu.memory_space<vmem>>) attributes {dimension_semantics = [#tpu.dimension_semantics<parallel>], iteration_bounds = array<i64: 1>, scalar_prefetch = 0 : i64, scratch_operands = 0 : i64, tpu.core_type = #tpu.core_type<tc>, window_params = [{transform_indices = @transform_0, window_bounds = array<i64: 2, 1024>}, {transform_indices = @transform_1, window_bounds = array<i64: 2, 1024>}]} {
    %c0 = arith.constant 0 : index
    %c0_0 = arith.constant 0 : index
    %0 = vector.load %arg1[%c0, %c0_0] : memref<2x1024xf32, #tpu.memory_space<vmem>>, vector<2x1024xf32>
    %cst = arith.constant 3.000000e+00 : f32
    %1 = vector.broadcast %cst : f32 to vector<2x1024xf32>
    %2 = arith.addf %0, %1 : vector<2x1024xf32>
    %cst_1 = arith.constant 0.000000e+00 : f32
    %cst_2 = arith.constant 6.000000e+00 : f32
    %3 = vector.broadcast %cst_1 : f32 to vector<2x1024xf32>
    %4 = arith.maximumf %3, %2 : vector<2x1024xf32>
    %5 = vector.broadcast %cst_2 : f32 to vector<2x1024xf32>
    %6 = arith.minimumf %5, %4 : vector<2x1024xf32>
    %7 = arith.mulf %0, %6 : vector<2x1024xf32>
    %cst_3 = arith.constant 6.000000e+00 : f32
    %8 = vector.broadcast %cst_3 : f32 to vector<2x1024xf32>
    %9 = arith.divf %7, %8 : vector<2x1024xf32>
    %c0_4 = arith.constant 0 : index
    %c0_5 = arith.constant 0 : index
    %10 = vector.load %arg2[%c0_4, %c0_5] : memref<2x1024xf32, #tpu.memory_space<vmem>>, vector<2x1024xf32>
    tpu.vector_store %arg2[%c0_4, %c0_5], %9 {strides = array<i32>} : memref<2x1024xf32, #tpu.memory_space<vmem>>, vector<2x1024xf32>,
    return
  }
  func.func @transform_0(%arg0: i32) -> (i32, i32) {
    %c0_i32 = arith.constant 0 : i32
    %c0_i32_0 = arith.constant 0 : i32
    return %arg0, %c0_i32 : i32, i32
  }
  func.func @transform_1(%arg0: i32) -> (i32, i32) {
    %c0_i32 = arith.constant 0 : i32
    %c0_i32_0 = arith.constant 0 : i32
    return %arg0, %c0_i32 : i32, i32
  }
}

</mosaic_0001>

<bundles_post_ra>
// kernel: tpu_custom_call.1
= control target key start
LH: loop header
LB: loop body
LE: loop exit
PB: predicated region body
PF: predicated region fallthrough
CT: control target
= control target key end

     0   :  { %6 = vsyncpa [#allocation3], 0  ;;  %s137_s0 = inlined_call_operand.hbm [shape: f32[2,1024], index: 0, kind: input, shape index: {}]   ;;  %s138_s1 = inlined_call_operand.hbm [shape: f32[2,1024], index: 1, kind: output, shape index: {}]  }
   0x1   :  { %7 = vsyncpa [#allocation4], 0  ;;  %s101_s6 = smov [#allocation2]   ;;  %s53_s10 = scalar_lea.hbm %s137_s0, 256 }
   0x2   :  { %s14_s7 = sshll.u32 %s101_s6, 4  ;;  %p54_p0 = scmp.ne.s32.totalorder %s137_s0, %s53_s10  ;;  %s15_s7 = int_to_ptr.vmem [resolvable:$true] %s14_s7 }
   0x3   :  { %p57_p1 = scmp.lt.u32.totalorder %s53_s10, %s137_s0 }
   0x5   :  { %p59_p2 = pnand %p57_p1, %p54_p0 }
   0x7   :  { %62 = shalt.err (!%p59_p2)
}
   0x8   :  { %s63_s15 = scalar_lea.vmem %s15_s7, 256  ;;  %p68_p4 = scmp.lt.s32.totalorder %s15_s7, %s15_s7 }
   0x9   :  { %p64_p3 = scmp.ne.s32.totalorder %s15_s7, %s63_s15  ;;  %p69_p5 = scmp.lt.s32.totalorder %s63_s15, %s63_s15 }
   0xb   :  { %p70_p6 = por %p69_p5, %p68_p4 }
   0xd   :  { %p71_p7 = pnand %p70_p6, %p64_p3 }
   0xf   :  { %74 = shalt.err (!%p71_p7)
}
  0x10   :  { %17 = dma.hbm_to_vmem [thread:$0]  %s137_s0, 256, %s15_s7, [#allocation3]  }
  0x11   :  { %97 = dma.done.wait [#allocation3], 256  }
  0x12   :  { %98 = vsyncadd [#allocation3], 4294967040  ;;  %v21_v0 = vld [vmem:[#allocation2] sm:$0xff]  ;;  %v22_v1 = vld [vmem:[#allocation2 + $0x8] sm:$0xff]  ;;  %s102_s18 = smov [#allocation5]  }
  0x13   :  { %v23_v2 = vadd.f32 3.0, %v21_v0  ;;  %v24_v3 = vadd.f32 3.0, %v22_v1  ;;  %s42_s19 = sshll.u32 %s102_s18, 4  ;;  %s43_s19 = int_to_ptr.vmem [resolvable:$true] %s42_s19 }
  0x14   :  { %s75_s0 = scalar_lea.vmem %s43_s19, 256  ;;  %p80_p9 = scmp.lt.s32.totalorder %s43_s19, %s43_s19 }
  0x15   :  { %v25_v4 = vmax.f32 %v23_v2, 0.0  ;;  %v26_v5 = vmax.f32 %v24_v3, 0.0  ;;  %p76_p8 = scmp.ne.s32.totalorder %s43_s19, %s75_s0  ;;  %p81_p10 = scmp.lt.s32.totalorder %s75_s0, %s75_s0 }
  0x17   :  { %v27_v6 = vmin.f32 %v25_v4, 6.0  ;;  %v28_v7 = vmin.f32 %v26_v5, 6.0  ;;  %p82_p11 = por %p81_p10, %p80_p9 }
  0x19   :  { %v29_v8 = vmul.f32 %v27_v6, %v21_v0  ;;  %v30_v9 = vmul.f32 %v28_v7, %v22_v1  ;;  %p83_p12 = pnand %p82_p11, %p76_p8 }
  0x1b   :  { %v32_v10 = vmul.f32 0.16666667, %v29_v8  ;;  %v33_v11 = vmul.f32 0.16666667, %v30_v9 }
  0x1d   :  { %34 = vst [vmem:[#allocation5] sm:$0xff] %v32_v10  ;;  %35 = vst [vmem:[#allocation5 + $0x8] sm:$0xff] %v33_v11 }
  0x1e   :  { %86 = shalt.err (!%p83_p12)
}
  0x1f   :  { %s87_s22 = scalar_lea.hbm %s138_s1, 256 }
  0x20   :  { %p88_p13 = scmp.ne.s32.totalorder %s138_s1, %s87_s22  ;;  %p91_p0 = scmp.lt.u32.totalorder %s87_s22, %s138_s1 }
  0x22   :  { %p93_p1 = pnand %p91_p0, %p88_p13 }
  0x24   :  { %96 = shalt.err (!%p93_p1)
}
  0x25   :  { %45 = dma.vmem_to_hbm [thread:$0]  %s43_s19, 256, %s138_s1, [#allocation4]  }
  0x26   :  { %99 = dma.done.wait [#allocation4], 256  }
  0x27   :  { %100 = vsyncadd [#allocation4], 4294967040 }
  0x28   :  { %49 = vsyncpa [#allocation3], 1 }
  0x29   :  { %50 = vsyncpa [#allocation4], 1 }

</bundles_post_ra>
